<compile_context>
chip_gen: v7x
topology: tpu7x:2x2x1
jax: 0.10.0
libtpu: 0.0.40
codegen_flags: <defaults>
</compile_context>

<pallas_src>
import functools
import math

import jax
import jax.numpy as jnp
from jax.experimental import pallas as pl
from jax.experimental.pallas import tpu as pltpu


def netsoftmax_kernel(x_ref, w1_ref, b1_ref, w2_ref, b2_ref,
                      w3_ref, b3_ref, w4_ref, b4_ref, m_ref, out_ref,
                      *, matmul_dtype):
    mm = matmul_dtype
    x = x_ref[...].astype(mm)

    h = jnp.dot(x, w1_ref[...].astype(mm), preferred_element_type=jnp.float32)
    h = jnp.maximum(h + b1_ref[...], 0.0)

    h = jnp.dot(h.astype(mm), w2_ref[...].astype(mm),
                preferred_element_type=jnp.float32)
    h = jnp.maximum(h + b2_ref[...], 0.0)

    h = jnp.dot(h.astype(mm), w3_ref[...].astype(mm),
                preferred_element_type=jnp.float32)
    h = jnp.maximum(h + b3_ref[...], 0.0)

    z = jnp.dot(h.astype(mm), w4_ref[...].astype(mm),
                preferred_element_type=jnp.float32) + b4_ref[...]

    # Row-wide max is a constant shift within every contiguous softmax group,
    # so this is exactly the per-group softmax (only underflow headroom shrinks).
    e = jnp.exp(z - jnp.max(z, axis=-1, keepdims=True))
    # Grouped denominator in a single MXU pass; kept in f32 regardless of
    # matmul_dtype so exp values are never quantized before the sum.
    denom = jnp.dot(e, m_ref[...], preferred_element_type=jnp.float32)
    # Reciprocal on the EUP instead of a VALU divide (~1e-3 normalization).
    out_ref[...] = (e * pl.reciprocal(denom, approx=True)).astype(out_ref.dtype)


def netsoftmax_forward(x, params, num_users, num_servers, *,
                       pack=None, block_rows=512, matmul_dtype=jnp.float32):
    """x: (B, num_users) f32 -> (B, num_users*num_servers) f32 (per-user softmax)."""
    w1, b1, w2, b2, w3, b3, w4, b4 = params
    B, U = x.shape
    S = int(num_servers)
    out_dim = U * S

    # ---- lane-packing factor P: fold P batch rows into lanes so the packed
    # output last dim is a multiple of 128 (unmasked stores, dense vregs).
    if pack is None:
        P = 128 // math.gcd(out_dim, 128)          # minimal P with P*out_dim % 128 == 0
        while P * 2 * out_dim <= 512 and B >= P * 2 * 8:
            P *= 2                                  # denser input lanes when B is large
    else:
        P = int(pack)
    P = max(1, P)

    # ---- pad batch to a multiple of P and reshape rows into lanes (free in HBM).
    Bp = -(-B // P) * P
    if Bp != B:
        x = jnp.concatenate([x, jnp.zeros((Bp - B, U), x.dtype)], axis=0)
    R = Bp // P                                     # packed "super rows"
    xp = x.reshape(R, P * U)

    # ---- block-diagonal packed parameters: W' = I_P (x) W, b' = tile(b, P).
    eye_p = jnp.eye(P, dtype=jnp.float32)
    w1p, w2p, w3p, w4p = (jnp.kron(eye_p, w) for w in (w1, w2, w3, w4))
    b1p, b2p, b3p, b4p = (jnp.tile(b, (1, P)) for b in (b1, b2, b3, b4))
    # Packed group-sum matrix: M[i, j] = 1 iff packed columns i, j share a
    # softmax group (groups are contiguous runs of S columns).
    cols = jnp.arange(P * out_dim)
    mp = (cols[:, None] // S == cols[None, :] // S).astype(jnp.float32)

    # ---- batch tiling over packed super rows.
    tb = min(block_rows, R)
    if tb < R:
        tb = max(8, (tb // 8) * 8)                  # sublane-aligned interior tiles
    elif R >= 16:
        # Guarantee >=2 grid steps so "parallel" spans both v7x TensorCores.
        tb = max(8, ((-(-R // 2)) // 8) * 8)
    Rp = -(-R // tb) * tb
    if Rp != R:                                     # pad with zero rows (sliced off)
        xp = jnp.concatenate([xp, jnp.zeros((Rp - R, P * U), xp.dtype)], axis=0)
    grid = (Rp // tb,)

    const = lambda i: (0, 0)                        # weights/biases/M stay resident
    kernel = functools.partial(netsoftmax_kernel, matmul_dtype=matmul_dtype)

    outp = pl.pallas_call(
        kernel,
        out_shape=jax.ShapeDtypeStruct((Rp, P * out_dim), jnp.float32),
        grid=grid,
        in_specs=[
            pl.BlockSpec((tb, P * U), lambda i: (i, 0)),
            pl.BlockSpec(w1p.shape, const), pl.BlockSpec(b1p.shape, const),
            pl.BlockSpec(w2p.shape, const), pl.BlockSpec(b2p.shape, const),
            pl.BlockSpec(w3p.shape, const), pl.BlockSpec(b3p.shape, const),
            pl.BlockSpec(w4p.shape, const), pl.BlockSpec(b4p.shape, const),
            pl.BlockSpec(mp.shape, const),
        ],
        out_specs=pl.BlockSpec((tb, P * out_dim), lambda i: (i, 0)),
        compiler_params=pltpu.CompilerParams(
            dimension_semantics=("parallel",),
        ),
    )(xp, w1p, b1p, w2p, b2p, w3p, b3p, w4p, b4p, mp)

    # Unpack lanes back into rows (free row-major reshape) and drop padding.
    return outp.reshape(Rp * P, out_dim)[:B]


def init_params(key, num_users, num_servers):
    """Deterministic synthetic Linear params, stored as (in, out) + (1, out)."""
    dims = [
        (num_users, num_servers * num_users),   # l1
        (num_servers * num_users, num_users),   # l2
        (num_users, num_users),                 # l3
        (num_users, num_users * num_servers),   # l4
    ]
    params = []
    for din, dout in dims:
        key, kw, kb = jax.random.split(key, 3)
        bound = 1.0 / jnp.sqrt(din)
        w = jax.random.uniform(kw, (din, dout), jnp.float32, -bound, bound)
        b = jax.random.uniform(kb, (1, dout), jnp.float32, -bound, bound)
        params += [w, b]
    return params


def reference_forward(x, params, num_users, num_servers):
    """Pure-JAX reference matching the PyTorch forward semantics."""
    w1, b1, w2, b2, w3, b3, w4, b4 = params
    h = jnp.maximum(x @ w1 + b1, 0.0)
    h = jnp.maximum(h @ w2 + b2, 0.0)
    h = jnp.maximum(h @ w3 + b3, 0.0)
    z = (h @ w4 + b4).reshape(x.shape[0], num_users, num_servers)
    return jax.nn.softmax(z, axis=2).reshape(x.shape[0], -1)


if __name__ == "__main__":
    num_users = 8
    num_servers = 4
    batch = 4

    key = jax.random.PRNGKey(0)
    key, kx = jax.random.split(key)
    x = jax.random.normal(kx, (batch, num_users), jnp.float32)

    params = init_params(key, num_users, num_servers)

    out = netsoftmax_forward(x, params, num_users, num_servers)
    out = jax.block_until_ready(out)

    ref = reference_forward(x, params, num_users, num_servers)
    assert out.shape == (batch, num_users * num_servers)
    # Tolerance relaxed vs. 1e-5 because of the approximate EUP reciprocal
    # (use pl.reciprocal(..., approx=False) if exact normalization is needed).
    assert jnp.allclose(out, ref, atol=5e-3, rtol=5e-3)
    # Each per-user softmax group must sum to ~1.
    gsums = out.reshape(batch, num_users, num_servers).sum(axis=-1)
    assert jnp.allclose(gsums, 1.0, atol=5e-3)

    print("KERNEL_OK")
</pallas_src>

<mosaic_0001>
module attributes {stable_mosaic.version = 11 : i64} {
  func.func @netsoftmax_kernel(%arg0: i32, %arg1: memref<1x32xf32, #tpu.memory_space<vmem>>, %arg2: memref<32x128xf32, #tpu.memory_space<vmem>>, %arg3: memref<1x128xf32, #tpu.memory_space<vmem>>, %arg4: memref<128x32xf32, #tpu.memory_space<vmem>>, %arg5: memref<1x32xf32, #tpu.memory_space<vmem>>, %arg6: memref<32x32xf32, #tpu.memory_space<vmem>>, %arg7: memref<1x32xf32, #tpu.memory_space<vmem>>, %arg8: memref<32x128xf32, #tpu.memory_space<vmem>>, %arg9: memref<1x128xf32, #tpu.memory_space<vmem>>, %arg10: memref<128x128xf32, #tpu.memory_space<vmem>>, %arg11: memref<1x128xf32, #tpu.memory_space<vmem>>) attributes {dimension_semantics = [#tpu.dimension_semantics<parallel>], iteration_bounds = array<i64: 1>, scalar_prefetch = 0 : i64, scratch_operands = 0 : i64, tpu.core_type = #tpu.core_type<tc>, window_params = [{transform_indices = @transform_0, window_bounds = array<i64: 1, 32>}, {pipeline_mode = #tpu.pipeline_mode<synchronous>, transform_indices = @transform_1, window_bounds = array<i64: 32, 128>}, {pipeline_mode = #tpu.pipeline_mode<synchronous>, transform_indices = @transform_2, window_bounds = array<i64: 1, 128>}, {pipeline_mode = #tpu.pipeline_mode<synchronous>, transform_indices = @transform_3, window_bounds = array<i64: 128, 32>}, {pipeline_mode = #tpu.pipeline_mode<synchronous>, transform_indices = @transform_4, window_bounds = array<i64: 1, 32>}, {pipeline_mode = #tpu.pipeline_mode<synchronous>, transform_indices = @transform_5, window_bounds = array<i64: 32, 32>}, {pipeline_mode = #tpu.pipeline_mode<synchronous>, transform_indices = @transform_6, window_bounds = array<i64: 1, 32>}, {pipeline_mode = #tpu.pipeline_mode<synchronous>, transform_indices = @transform_7, window_bounds = array<i64: 32, 128>}, {pipeline_mode = #tpu.pipeline_mode<synchronous>, transform_indices = @transform_8, window_bounds = array<i64: 1, 128>}, {pipeline_mode = #tpu.pipeline_mode<synchronous>, transform_indices = @transform_9, window_bounds = array<i64: 128, 128>}, {transform_indices = @transform_10, window_bounds = array<i64: 1, 128>}]} {
    %c0 = arith.constant 0 : index
    %c0_0 = arith.constant 0 : index
    %0 = vector.load %arg1[%c0, %c0_0] : memref<1x32xf32, #tpu.memory_space<vmem>>, vector<1x32xf32>
    %c0_1 = arith.constant 0 : index
    %c0_2 = arith.constant 0 : index
    %1 = vector.load %arg2[%c0_1, %c0_2] : memref<32x128xf32, #tpu.memory_space<vmem>>, vector<32x128xf32>
    %cst = arith.constant dense<0.000000e+00> : vector<1x128xf32>
    %2 = tpu.matmul %0, %1, %cst {dimension_numbers = #tpu.dot_dimension_numbers<[1], [0], [0], [1], [0, 0, 1, 1], [], []>} : vector<1x32xf32>, vector<32x128xf32>, vector<1x128xf32> -> vector<1x128xf32>
    %c0_3 = arith.constant 0 : index
    %c0_4 = arith.constant 0 : index
    %3 = vector.load %arg3[%c0_3, %c0_4] : memref<1x128xf32, #tpu.memory_space<vmem>>, vector<1x128xf32>
    %4 = arith.addf %2, %3 : vector<1x128xf32>
    %cst_5 = arith.constant 0.000000e+00 : f32
    %5 = vector.broadcast %cst_5 : f32 to vector<1x128xf32>
    %6 = arith.maximumf %4, %5 : vector<1x128xf32>
    %c0_6 = arith.constant 0 : index
    %c0_7 = arith.constant 0 : index
    %7 = vector.load %arg4[%c0_6, %c0_7] : memref<128x32xf32, #tpu.memory_space<vmem>>, vector<128x32xf32>
    %cst_8 = arith.constant dense<0.000000e+00> : vector<1x32xf32>
    %8 = tpu.matmul %6, %7, %cst_8 {dimension_numbers = #tpu.dot_dimension_numbers<[1], [0], [0], [1], [0, 0, 1, 1], [], []>} : vector<1x128xf32>, vector<128x32xf32>, vector<1x32xf32> -> vector<1x32xf32>
    %c0_9 = arith.constant 0 : index
    %c0_10 = arith.constant 0 : index
    %9 = vector.load %arg5[%c0_9, %c0_10] : memref<1x32xf32, #tpu.memory_space<vmem>>, vector<1x32xf32>
    %10 = arith.addf %8, %9 : vector<1x32xf32>
    %cst_11 = arith.constant 0.000000e+00 : f32
    %11 = vector.broadcast %cst_11 : f32 to vector<1x32xf32>
    %12 = arith.maximumf %10, %11 : vector<1x32xf32>
    %c0_12 = arith.constant 0 : index
    %c0_13 = arith.constant 0 : index
    %13 = vector.load %arg6[%c0_12, %c0_13] : memref<32x32xf32, #tpu.memory_space<vmem>>, vector<32x32xf32>
    %cst_14 = arith.constant dense<0.000000e+00> : vector<1x32xf32>
    %14 = tpu.matmul %12, %13, %cst_14 {dimension_numbers = #tpu.dot_dimension_numbers<[1], [0], [0], [1], [0, 0, 1, 1], [], []>} : vector<1x32xf32>, vector<32x32xf32>, vector<1x32xf32> -> vector<1x32xf32>
    %c0_15 = arith.constant 0 : index
    %c0_16 = arith.constant 0 : index
    %15 = vector.load %arg7[%c0_15, %c0_16] : memref<1x32xf32, #tpu.memory_space<vmem>>, vector<1x32xf32>
    %16 = arith.addf %14, %15 : vector<1x32xf32>
    %cst_17 = arith.constant 0.000000e+00 : f32
    %17 = vector.broadcast %cst_17 : f32 to vector<1x32xf32>
    %18 = arith.maximumf %16, %17 : vector<1x32xf32>
    %c0_18 = arith.constant 0 : index
    %c0_19 = arith.constant 0 : index
    %19 = vector.load %arg8[%c0_18, %c0_19] : memref<32x128xf32, #tpu.memory_space<vmem>>, vector<32x128xf32>
    %cst_20 = arith.constant dense<0.000000e+00> : vector<1x128xf32>
    %20 = tpu.matmul %18, %19, %cst_20 {dimension_numbers = #tpu.dot_dimension_numbers<[1], [0], [0], [1], [0, 0, 1, 1], [], []>} : vector<1x32xf32>, vector<32x128xf32>, vector<1x128xf32> -> vector<1x128xf32>
    %c0_21 = arith.constant 0 : index
    %c0_22 = arith.constant 0 : index
    %21 = vector.load %arg9[%c0_21, %c0_22] : memref<1x128xf32, #tpu.memory_space<vmem>>, vector<1x128xf32>
    %22 = arith.addf %20, %21 : vector<1x128xf32>
    %cst_23 = arith.constant dense<0xFF800000> : vector<1xf32>
    %23 = vector.multi_reduction <maximumf>, %22, %cst_23 [1] : vector<1x128xf32> to vector<1xf32>
    %24 = vector.shape_cast %23 : vector<1xf32> to vector<1x1xf32>
    %25 = vector.broadcast %24 : vector<1x1xf32> to vector<1x128xf32>
    %26 = arith.subf %22, %25 : vector<1x128xf32>
    %27 = math.exp %26 : vector<1x128xf32>
    %c0_24 = arith.constant 0 : index
    %c0_25 = arith.constant 0 : index
    %28 = vector.load %arg10[%c0_24, %c0_25] : memref<128x128xf32, #tpu.memory_space<vmem>>, vector<128x128xf32>
    %cst_26 = arith.constant dense<0.000000e+00> : vector<1x128xf32>
    %29 = tpu.matmul %27, %28, %cst_26 {dimension_numbers = #tpu.dot_dimension_numbers<[1], [0], [0], [1], [0, 0, 1, 1], [], []>} : vector<1x128xf32>, vector<128x128xf32>, vector<1x128xf32> -> vector<1x128xf32>
    %30 = tpu.reciprocal %29 {approx = true} : vector<1x128xf32> -> vector<1x128xf32>
    %31 = arith.mulf %27, %30 : vector<1x128xf32>
    %c0_27 = arith.constant 0 : index
    %c0_28 = arith.constant 0 : index
    %32 = vector.load %arg11[%c0_27, %c0_28] : memref<1x128xf32, #tpu.memory_space<vmem>>, vector<1x128xf32>
    tpu.vector_store %arg11[%c0_27, %c0_28], %31 {strides = array<i32>} : memref<1x128xf32, #tpu.memory_space<vmem>>, vector<1x128xf32>,
    return
  }
  func.func @transform_0(%arg0: i32) -> (i32, i32) {
    %c0_i32 = arith.constant 0 : i32
    %c0_i32_0 = arith.constant 0 : i32
    return %arg0, %c0_i32 : i32, i32
  }
  func.func @transform_1(%arg0: i32) -> (i32, i32) {
    %c0_i32 = arith.constant 0 : i32
    %c0_i32_0 = arith.constant 0 : i32
    %c0_i32_1 = arith.constant 0 : i32
    return %c0_i32, %c0_i32_0 : i32, i32
  }
  func.func @transform_2(%arg0: i32) -> (i32, i32) {
    %c0_i32 = arith.constant 0 : i32
    %c0_i32_0 = arith.constant 0 : i32
    %c0_i32_1 = arith.constant 0 : i32
    return %c0_i32, %c0_i32_0 : i32, i32
  }
  func.func @transform_3(%arg0: i32) -> (i32, i32) {
    %c0_i32 = arith.constant 0 : i32
    %c0_i32_0 = arith.constant 0 : i32
    %c0_i32_1 = arith.constant 0 : i32
    return %c0_i32, %c0_i32_0 : i32, i32
  }
  func.func @transform_4(%arg0: i32) -> (i32, i32) {
    %c0_i32 = arith.constant 0 : i32
    %c0_i32_0 = arith.constant 0 : i32
    %c0_i32_1 = arith.constant 0 : i32
    return %c0_i32, %c0_i32_0 : i32, i32
  }
  func.func @transform_5(%arg0: i32) -> (i32, i32) {
    %c0_i32 = arith.constant 0 : i32
    %c0_i32_0 = arith.constant 0 : i32
    %c0_i32_1 = arith.constant 0 : i32
    return %c0_i32, %c0_i32_0 : i32, i32
  }
  func.func @transform_6(%arg0: i32) -> (i32, i32) {
    %c0_i32 = arith.constant 0 : i32
    %c0_i32_0 = arith.constant 0 : i32
    %c0_i32_1 = arith.constant 0 : i32
    return %c0_i32, %c0_i32_0 : i32, i32
  }
  func.func @transform_7(%arg0: i32) -> (i32, i32) {
    %c0_i32 = arith.constant 0 : i32
    %c0_i32_0 = arith.constant 0 : i32
    %c0_i32_1 = arith.constant 0 : i32
    return %c0_i32, %c0_i32_0 : i32, i32
  }
  func.func @transform_8(%arg0: i32) -> (i32, i32) {
    %c0_i32 = arith.constant 0 : i32
    %c0_i32_0 = arith.constant 0 : i32
    %c0_i32_1 = arith.constant 0 : i32
    return %c0_i32, %c0_i32_0 : i32, i32
  }
  func.func @transform_9(%arg0: i32) -> (i32, i32) {
    %c0_i32 = arith.constant 0 : i32
    %c0_i32_0 = arith.constant 0 : i32
    %c0_i32_1 = arith.constant 0 : i32
    return %c0_i32, %c0_i32_0 : i32, i32
  }
  func.func @transform_10(%arg0: i32) -> (i32, i32) {
    %c0_i32 = arith.constant 0 : i32
    %c0_i32_0 = arith.constant 0 : i32
    return %arg0, %c0_i32 : i32, i32
  }
}

</mosaic_0001>

<bundles_post_ra>
// kernel: tpu_custom_call.1
= control target key start
LH: loop header
LB: loop body
LE: loop exit
PB: predicated region body
PF: predicated region fallthrough
CT: control target
= control target key end

     0   :  { %15 = vsyncpa [#allocation3], 0  ;;  %s1163_s0 = inlined_call_operand.vmem [shape: f32[1,32], index: 0, kind: input, shape index: {}]   ;;  %s1164_s1 = inlined_call_operand.vmem [shape: f32[32,128], index: 1, kind: input, shape index: {}]   ;;  %s1165_s2 = inlined_call_operand.vmem [shape: f32[1,128], index: 2, kind: input, shape index: {}]   ;;  %s1166_s3 = inlined_call_operand.vmem [shape: f32[128,32], index: 3, kind: input, shape index: {}]   ;;  %s1167_s4 = inlined_call_operand.hbm [shape: f32[1,32], index: 4, kind: input, shape index: {}]   ;;  %s1168_s5 = inlined_call_operand.vmem [shape: f32[32,32], index: 5, kind: input, shape index: {}]   ;;  %s1169_s6 = inlined_call_operand.hbm [shape: f32[1,32], index: 6, kind: input, shape index: {}]   ;;  %s1170_s7 = inlined_call_operand.hbm [shape: f32[32,128], index: 7, kind: input, shape index: {}]   ;;  %s1171_s8 = inlined_call_operand.hbm [shape: f32[1,128], index: 8, kind: input, shape index: {}]   ;;  %s1172_s9 = inlined_call_operand.vmem [shape: f32[128,128], index: 9, kind: input, shape index: {}]   ;;  %s1173_s10 = inlined_call_operand.hbm [shape: f32[1,128], index: 10, kind: output, shape index: {}]  }
   0x1   :  { %16 = vsyncpa [#allocation6], 0 }
   0x2   :  { %17 = vsyncpa [#allocation9], 0 }
   0x3   :  { %18 = vsyncpa [#allocation4], 0  ;;  %s877_s13 = smov [#allocation5]   ;;  %s878_s15 = smov [#allocation2]  }
   0x4   :  { %s45_s14 = sshll.u32 %s877_s13, 4  ;;  %s33_s16 = sshll.u32 %s878_s15, 4  ;;  %s46_s14 = int_to_ptr.vmem [resolvable:$true] %s45_s14  ;;  %s34_s16 = int_to_ptr.vmem [resolvable:$true] %s33_s16 }
   0x5   :  { %s759_s19 = scalar_lea.hbm %s1169_s6, 16 }
   0x6   :  { %p760_p0 = scmp.ne.s32.totalorder %s1169_s6, %s759_s19  ;;  %p763_p1 = scmp.lt.u32.totalorder %s759_s19, %s1169_s6 }
   0x8   :  { %p765_p2 = pnand %p763_p1, %p760_p0 }
   0xa   :  { %768 = shalt.err (!%p765_p2)
}
   0xb   :  { %s769_s24 = scalar_lea.vmem %s46_s14, 16  ;;  %s773_s25 = scalar_lea.vmem %s46_s14, 32 }
   0xc   :  { %p770_p3 = scmp.ne.s32.totalorder %s46_s14, %s769_s24  ;;  %p774_p4 = scmp.lt.s32.totalorder %s46_s14, %s46_s14 }
   0xd   :  { %p775_p5 = scmp.lt.s32.totalorder %s773_s25, %s769_s24 }
   0xf   :  { %p776_p6 = por %p775_p5, %p774_p4 }
  0x11   :  { %p777_p7 = pnand %p776_p6, %p770_p3 }
  0x13   :  { %780 = shalt.err (!%p777_p7)
}
  0x14   :  { %48 = dma.hbm_to_vmem [thread:$0]  %s1169_s6, 16, %s46_s14, [#allocation6]  }
  0x15   :  { %s781_s30 = scalar_lea.hbm %s1167_s4, 16 }
  0x16   :  { %p782_p8 = scmp.ne.s32.totalorder %s1167_s4, %s781_s30  ;;  %p785_p9 = scmp.lt.u32.totalorder %s781_s30, %s1167_s4 }
  0x18   :  { %p787_p10 = pnand %p785_p9, %p782_p8 }
  0x1a   :  { %790 = shalt.err (!%p787_p10)
}
  0x1b   :  { %s791_s17 = scalar_lea.vmem %s34_s16, 16  ;;  %s795_s18 = scalar_lea.vmem %s34_s16, 32 }
  0x1c   :  { %p792_p11 = scmp.ne.s32.totalorder %s34_s16, %s791_s17  ;;  %p796_p12 = scmp.lt.s32.totalorder %s34_s16, %s34_s16 }
  0x1d   :  { %p797_p13 = scmp.lt.s32.totalorder %s795_s18, %s791_s17 }
  0x1f   :  { %p798_p0 = por %p797_p13, %p796_p12 }
  0x21   :  { %p799_p1 = pnand %p798_p0, %p792_p11 }
  0x23   :  { %802 = shalt.err (!%p799_p1)
}
  0x24   :  { %36 = dma.hbm_to_vmem [thread:$0]  %s1167_s4, 16, %s34_s16, [#allocation3]  }
  0x25   :  { %s879_s19 = smov [#allocation7]   ;;  %s803_s23 = scalar_lea.hbm %s1170_s7, 512 }
  0x26   :  { %s54_s20 = sshll.u32 %s879_s19, 4  ;;  %p804_p2 = scmp.ne.s32.totalorder %s1170_s7, %s803_s23  ;;  %s55_s20 = int_to_ptr.vmem [resolvable:$true] %s54_s20 }
  0x27   :  { %p807_p3 = scmp.lt.u32.totalorder %s803_s23, %s1170_s7 }
  0x29   :  { %p809_p4 = pnand %p807_p3, %p804_p2 }
  0x2b   :  { %812 = shalt.err (!%p809_p4)
}
  0x2c   :  { %s813_s28 = scalar_lea.vmem %s55_s20, 512  ;;  %p818_p6 = scmp.lt.s32.totalorder %s55_s20, %s55_s20 }
  0x2d   :  { %p814_p5 = scmp.ne.s32.totalorder %s55_s20, %s813_s28  ;;  %p819_p7 = scmp.lt.s32.totalorder %s813_s28, %s813_s28 }
  0x2f   :  { %p820_p8 = por %p819_p7, %p818_p6 }
  0x31   :  { %p821_p9 = pnand %p820_p8, %p814_p5 }
  0x33   :  { %824 = shalt.err (!%p821_p9)
}
  0x34   :  { %s880_s4 = smov 128   ;;  %s881_s16 = smov 8  }
  0x35   :  { %60 = dma.hbm_to_vmem [thread:$0]  %s1170_s7, 512, %s55_s20, [#allocation6], %s880_s4, %s880_s4, %s881_s16  }
  0x36   :  { %s882_s11 = smov [#allocation8]   ;;  %s825_s17 = scalar_lea.hbm %s1171_s8, 16 }
  0x37   :  { %s67_s12 = sshll.u32 %s882_s11, 4  ;;  %p826_p10 = scmp.ne.s32.totalorder %s1171_s8, %s825_s17  ;;  %s68_s12 = int_to_ptr.vmem [resolvable:$true] %s67_s12 }
  0x38   :  { %p829_p11 = scmp.lt.u32.totalorder %s825_s17, %s1171_s8 }
  0x3a   :  { %p831_p12 = pnand %p829_p11, %p826_p10 }
  0x3c   :  { %834 = shalt.err (!%p831_p12)
}
  0x3d   :  { %s835_s21 = scalar_lea.vmem %s68_s12, 16  ;;  %s839_s7 = scalar_lea.vmem %s68_s12, 32 }
  0x3e   :  { %p836_p13 = scmp.ne.s32.totalorder %s68_s12, %s835_s21  ;;  %p840_p0 = scmp.lt.s32.totalorder %s68_s12, %s68_s12 }
  0x3f   :  { %p841_p1 = scmp.lt.s32.totalorder %s839_s7, %s835_s21 }
  0x41   :  { %p842_p2 = por %p841_p1, %p840_p0 }
  0x43   :  { %p843_p3 = pnand %p842_p2, %p836_p13 }
  0x45   :  { %846 = shalt.err (!%p843_p3)
}
  0x46   :  { %70 = dma.hbm_to_vmem [thread:$0]  %s1171_s8, 16, %s68_s12, [#allocation9]  }
  0x47   :  { %869 = dma.done.wait [#allocation3], 16  }
  0x48   :  { %870 = vsyncadd [#allocation3], 4294967280 }
  0x49   :  { %871 = dma.done.wait [#allocation6], 528  }
  0x4a   :  { %872 = vsyncadd [#allocation6], 4294966768 }
  0x4b   :  { %873 = dma.done.wait [#allocation9], 16  }
  0x4c   :  { %874 = vsyncadd [#allocation9], 4294967280  ;;  %v883_v0 = vmov 0.0|0.0   ;;  %vm884_vm0 = vmmov 0   ;;  %v885_v1 = vmov 0.0   ;;  %v86_v2 = vld [vmem:[%s1164_s1] sm:$0xff] }
  0x4d   :  { %679 = vmatprep.subr.bf16.mxu1 %v883_v0  ;;  %584 = vmatprep.mubr.msk.f32.mxu1 %vm884_vm0, %v885_v1  ;;  %v87_v3 = vld [vmem:[%s1164_s1 + $0x8] sm:$0xff]  ;;  %v88_v4 = vld [vmem:[%s1164_s1 + $0x10] sm:$0xff]  ;;  %v89_v6 = vld [vmem:[%s1164_s1 + $0x18] sm:$0xff]  ;;  %vm91_vm1 = vcmask 261120   ;;  %vm411_vm2 = vcmask 1040384   ;;  %s886_s8 = smov [#allocation10]  }
  0x4e   :  { %709 = vmatprep.subr.bf16.mxu0 %v883_v0  ;;  %630 = vmatprep.mubr.msk.f32.mxu0 %vm884_vm0, %v885_v1  ;;  %v680_v5 = vpack.c.bf16 %v87_v3, %v86_v2  ;;  %v683_v7 = vpack.c.bf16 %v89_v6, %v88_v4  ;;  %v166_v8 = vld [vmem:[%s1166_s3] sm:$0xff]  ;;  %v167_v9 = vld [vmem:[%s1166_s3 + $0x8] sm:$0xff]  ;;  %v168_v12 = vld [vmem:[%s1166_s3 + $0x10] sm:$0xff]  ;;  %s513_s23 = sshll.u32 %s886_s8, 4  ;;  %s514_s23 = int_to_ptr.vmem [resolvable:$true] %s513_s23 }
  0x4f   :  { %v85_v10 = vld [vmem:[%s1163_s0] sm:$0x1]  ;;  %v686_v11 = vpack.c.bf16 %v167_v9, %v166_v8  ;;  %v169_v13 = vld [vmem:[%s1166_s3 + $0x18] sm:$0xff]  ;;  %v171_v16 = vld [vmem:[%s1166_s3 + $0x28] sm:$0xff]  ;;  %s851_s24 = scalar_lea.vmem %s514_s23, 32  ;;  %p852_p5 = scmp.lt.s32.totalorder %s514_s23, %s514_s23 }
  0x50   :  { %681 = vmatpush3.bf16.msra.mxu1 %v680_v5  ;;  %v689_v14 = vpack.c.bf16 %v169_v13, %v168_v12  ;;  %v170_v15 = vld [vmem:[%s1166_s3 + $0x20] sm:$0xff]  ;;  %v172_v18 = vld [vmem:[%s1166_s3 + $0x30] sm:$0xff]  ;;  %v173_v19 = vld [vmem:[%s1166_s3 + $0x38] sm:$0xff] }
  0x51   :  { %682 = vmatprep.subr.bf16.mxu1 %v883_v0  ;;  %v692_v17 = vpack.c.bf16 %v171_v16, %v170_v15  ;;  %v695_v20 = vpack.c.bf16 %v173_v19, %v172_v18  ;;  %v174_v21 = vld [vmem:[%s1166_s3 + $0x40] sm:$0xff]  ;;  %v175_v22 = vld [vmem:[%s1166_s3 + $0x48] sm:$0xff]  ;;  %v176_v24 = vld [vmem:[%s1166_s3 + $0x50] sm:$0xff] }
  0x52   :  { %v698_v23 = vpack.c.bf16 %v175_v22, %v174_v21  ;;  %v177_v25 = vld [vmem:[%s1166_s3 + $0x58] sm:$0xff]  ;;  %v178_v27 = vld [vmem:[%s1166_s3 + $0x60] sm:$0xff]  ;;  %v179_v28 = vld [vmem:[%s1166_s3 + $0x68] sm:$0xff] }
  0x53   :  { %v701_v26 = vpack.c.bf16 %v177_v25, %v176_v24  ;;  %v704_v29 = vpack.c.bf16 %v179_v28, %v178_v27  ;;  %v180_v30 = vld [vmem:[%s1166_s3 + $0x70] sm:$0xff]  ;;  %v181_v31 = vld [vmem:[%s1166_s3 + $0x78] sm:$0xff]  ;;  %v254_v33 = vld [vmem:[%s1168_s5] sm:$0xff] }
  0x54   :  { %684 = vmatpush3.bf16.msra.mxu1 %v683_v7  ;;  %v707_v32 = vpack.c.bf16 %v181_v31, %v180_v30  ;;  %v255_v34 = vld [vmem:[%s1168_s5 + $0x8] sm:$0xff]  ;;  %v90_v36 = vld [vmem:[%s1165_s2] sm:$0x1]  ;;  %v256_v41 = vld [vmem:[%s1168_s5 + $0x10] sm:$0xff] }
  0x55   :  { %685 = vmatprep.subr.bf16.mxu1 %v883_v0  ;;  %v710_v35 = vpack.c.bf16 %v255_v34, %v254_v33  ;;  %v257_v42 = vld [vmem:[%s1168_s5 + $0x18] sm:$0xff]  ;;  %v182_v44 = vld [vmem:[#allocation2] sm:$0x1]  ;;  %v333_v45 = vld [vmem:[#allocation7] sm:$0xff] }
  0x56   :  { %v713_v43 = vpack.c.bf16 %v257_v42, %v256_v41  ;;  %v334_v46 = vld [vmem:[#allocation7 + $0x8] sm:$0xff]  ;;  %v335_v52 = vld [vmem:[#allocation7 + $0x10] sm:$0xff]  ;;  %v336_v53 = vld [vmem:[#allocation7 + $0x18] sm:$0xff] }
  0x57   :  { %585 = vmatmul.mubr.msk.f32.vlgmr.msra.gmra.mrb[0].mxu1 %vm91_vm1, %v85_v10  ;;  %711 = vmatpush3.bf16.msra.mxu0 %v710_v35  ;;  %v716_v50 = vpack.c.bf16 %v334_v46, %v333_v45  ;;  %v719_v54 = vpack.c.bf16 %v336_v53, %v335_v52  ;;  %v258_v55 = vld [vmem:[#allocation5] sm:$0x1]  ;;  %v419_v61 = vld [vmem:[%s1172_s9 + $0x8] sm:$0xff]  ;;  %v420_v62 = vld [vmem:[%s1172_s9 + $0x10] sm:$0xff] }
  0x58   :  { %687 = vmatpush3.bf16.msra.mxu1 %v686_v11  ;;  %619 = vmatprep.mubr.msk.f32.mxu1 %vm884_vm0, %v885_v1  ;;  %v418_v60 = vld [vmem:[%s1172_s9] sm:$0xff]  ;;  %v421_v2 = vld [vmem:[%s1172_s9 + $0x18] sm:$0xff]  ;;  %v423_v4 = vld [vmem:[%s1172_s9 + $0x28] sm:$0xff] }
  0x59   :  { %688 = vmatprep.subr.bf16.mxu1 %v883_v0  ;;  %712 = vmatprep.subr.bf16.mxu0 %v883_v0  ;;  %v722_v63 = vpack.c.bf16 %v419_v61, %v418_v60  ;;  %v725_v3 = vpack.c.bf16 %v421_v2, %v420_v62  ;;  %v424_v6 = vld [vmem:[%s1172_s9 + $0x30] sm:$0xff]  ;;  %v425_v7 = vld [vmem:[%s1172_s9 + $0x38] sm:$0xff]  ;;  %v337_v9 = vld [vmem:[#allocation8] sm:$0x1] }
  0x5a   :  { %v731_v8 = vpack.c.bf16 %v425_v7, %v424_v6  ;;  %v427_v15 = vld [vmem:[%s1172_s9 + $0x48] sm:$0xff]  ;;  %v429_v18 = vld [vmem:[%s1172_s9 + $0x58] sm:$0xff] }
  0x5b   :  { %714 = vmatpush3.bf16.msra.mxu0 %v713_v43  ;;  %v431_v21 = vld [vmem:[%s1172_s9 + $0x68] sm:$0xff]  ;;  %v433_v24 = vld [vmem:[%s1172_s9 + $0x78] sm:$0xff] }
  0x5c   :  { %690 = vmatpush3.bf16.msra.mxu1 %v689_v14  ;;  %715 = vmatprep.subr.bf16.mxu0 %v883_v0  ;;  %v426_v14 = vld [vmem:[%s1172_s9 + $0x40] sm:$0xff] }
  0x5d   :  { %691 = vmatprep.subr.bf16.mxu1 %v883_v0  ;;  %v734_v16 = vpack.c.bf16 %v427_v15, %v426_v14 }
  0x60   :  { %693 = vmatpush3.bf16.msra.mxu1 %v692_v17  ;;  %v428_v17 = vld [vmem:[%s1172_s9 + $0x50] sm:$0xff] }
  0x61   :  { %694 = vmatprep.subr.bf16.mxu1 %v883_v0  ;;  %v737_v19 = vpack.c.bf16 %v429_v18, %v428_v17 }
  0x64   :  { %696 = vmatpush3.bf16.msra.mxu1 %v695_v20  ;;  %v430_v20 = vld [vmem:[%s1172_s9 + $0x60] sm:$0xff] }
  0x65   :  { %697 = vmatprep.subr.bf16.mxu1 %v883_v0  ;;  %v740_v22 = vpack.c.bf16 %v431_v21, %v430_v20 }
  0x68   :  { %699 = vmatpush3.bf16.msra.mxu1 %v698_v23  ;;  %v432_v23 = vld [vmem:[%s1172_s9 + $0x70] sm:$0xff] }
  0x69   :  { %700 = vmatprep.subr.bf16.mxu1 %v883_v0  ;;  %v743_v25 = vpack.c.bf16 %v433_v24, %v432_v23 }
  0x6c   :  { %702 = vmatpush3.bf16.msra.mxu1 %v701_v26 }
  0x6d   :  { %703 = vmatprep.subr.bf16.mxu1 %v883_v0 }
  0x70   :  { %705 = vmatpush3.bf16.msra.mxu1 %v704_v29 }
  0x71   :  { %706 = vmatprep.subr.bf16.mxu1 %v883_v0 }
  0x74   :  { %708 = vmatpush3.bf16.msra.mxu1 %v707_v32 }
 0x12a   :  { %v161_v37 = vpop.f32.mrb[0].mxu1 }
 0x12b   :  { %v162_v38 = vadd.f32 %v161_v37, %v90_v36  ;;  %v586_v39 = vpop.f32.mrb[1].mxu1 }
 0x12d   :  { %v165_v40 = vmax.f32 %v162_v38, 0.0 }
 0x12f   :  { %620 = vmatmul.mubr.f32.vlgmr.msra.gmra.mrb[2].mxu1 %v165_v40 }
 0x202   :  { %v249_v47 = vpop.f32.mrb[2].mxu1 }
 0x203   :  { %v250_v48 = vadd.f32 %v249_v47, %v182_v44  ;;  %v621_v49 = vpop.f32.mrb[3].mxu1 }
 0x205   :  { %v253_v51 = vmax.f32 %v250_v48, 0.0 }
 0x207   :  { %631 = vmatmul.mubr.msk.f32.vlgmr.msra.gmra.mrb[0].mxu0 %vm91_vm1, %v253_v51 }
 0x208   :  { %717 = vmatpush3.bf16.msra.mxu0 %v716_v50  ;;  %641 = vmatprep.mubr.msk.f32.mxu0 %vm884_vm0, %v885_v1 }
 0x209   :  { %718 = vmatprep.subr.bf16.mxu0 %v883_v0 }
 0x20c   :  { %720 = vmatpush3.bf16.msra.mxu0 %v719_v54 }
 0x20d   :  { %721 = vmatprep.subr.bf16.mxu0 %v883_v0 }
 0x2da   :  { %v328_v56 = vpop.f32.mrb[0].mxu0 }
 0x2db   :  { %v329_v57 = vadd.f32 %v328_v56, %v258_v55  ;;  %v632_v58 = vpop.f32.mrb[1].mxu0 }
 0x2dd   :  { %v332_v59 = vmax.f32 %v329_v57, 0.0 }
 0x2df   :  { %642 = vmatmul.mubr.msk.f32.vlgmr.msra.gmra.mrb[2].mxu0 %vm91_vm1, %v332_v59 }
 0x2e0   :  { %676 = vmatprep.mubr.msk.f32.mxu0 %vm884_vm0, %v885_v1  ;;  %723 = vmatpush3.bf16.msra.mxu0 %v722_v63  ;;  %v422_v1 = vld [vmem:[%s1172_s9 + $0x20] sm:$0xff]  ;;  %s847_s9 = scalar_lea.vmem %s514_s23, 16 }
 0x2e1   :  { %724 = vmatprep.subr.bf16.mxu0 %v883_v0  ;;  %v728_v5 = vpack.c.bf16 %v423_v4, %v422_v1  ;;  %p848_p4 = scmp.ne.s32.totalorder %s514_s23, %s847_s9  ;;  %p853_p6 = scmp.lt.s32.totalorder %s851_s24, %s847_s9 }
 0x2e3   :  { %p854_p7 = por %p853_p6, %p852_p5 }
 0x2e4   :  { %726 = vmatpush3.bf16.msra.mxu0 %v725_v3 }
 0x2e5   :  { %727 = vmatprep.subr.bf16.mxu0 %v883_v0  ;;  %p855_p8 = pnand %p854_p7, %p848_p4 }
 0x2e8   :  { %729 = vmatpush3.bf16.msra.mxu0 %v728_v5 }
 0x2e9   :  { %730 = vmatprep.subr.bf16.mxu0 %v883_v0 }
 0x2ec   :  { %732 = vmatpush3.bf16.msra.mxu0 %v731_v8 }
 0x2ed   :  { %733 = vmatprep.subr.bf16.mxu0 %v883_v0 }
 0x2f0   :  { %735 = vmatpush3.bf16.msra.mxu0 %v734_v16 }
 0x2f1   :  { %736 = vmatprep.subr.bf16.mxu0 %v883_v0 }
 0x2f4   :  { %738 = vmatpush3.bf16.msra.mxu0 %v737_v19 }
 0x2f5   :  { %739 = vmatprep.subr.bf16.mxu0 %v883_v0 }
 0x2f8   :  { %741 = vmatpush3.bf16.msra.mxu0 %v740_v22 }
 0x2f9   :  { %742 = vmatprep.subr.bf16.mxu0 %v883_v0 }
 0x2fc   :  { %744 = vmatpush3.bf16.msra.mxu0 %v743_v25 }
 0x3b2   :  { %v407_v10 = vpop.f32.mrb[2].mxu0 }
 0x3b3   :  { %v408_v11 = vadd.f32 %v407_v10, %v337_v9  ;;  %v643_v12 = vpop.f32.mrb[3].mxu0 }
 0x3b5   :  { %v412_v13 = vsel %vm411_vm2, %v408_v11, -inf }
 0x3b6   :  { %413 = vmax.xlane.f32.xlu0 %v412_v13 }
 0x443   :  { %v414_v26 = vpop.xlane.xlu0 %413 }
 0x444   :  { %v415_v27 = vsub.f32 %v408_v11, %v414_v26 }
 0x446   :  { %v416_v28 = vmul.f32 1.442695, %v415_v27 }
 0x448   :  { %755 = vpow2.f32 %v416_v28 }
 0x452   :  { %v756_v29 = vpop.eup %755 }
 0x453   :  { %677 = vmatmul.mubr.f32.vlgmr.msra.gmra.mrb[4].mxu0 %v756_v29 }
 0x526   :  { %v500_v30 = vpop.f32.mrb[4].mxu0 }
 0x527   :  { %757 = vrcp.f32 %v500_v30  ;;  %v678_v31 = vpop.f32.mrb[5].mxu0 }
 0x531   :  { %v758_v32 = vpop.eup %757 }
 0x532   :  { %v505_v33 = vmul.f32 %v758_v32, %v756_v29 }
 0x534   :  { %506 = vst [vmem:[#allocation10] sm:$0x1] %v505_v33 }
 0x535   :  { %858 = shalt.err (!%p855_p8)
}
 0x536   :  { %s859_s27 = scalar_lea.hbm %s1173_s10, 16 }
 0x537   :  { %p860_p9 = scmp.ne.s32.totalorder %s1173_s10, %s859_s27  ;;  %p863_p10 = scmp.lt.u32.totalorder %s859_s27, %s1173_s10 }
 0x539   :  { %p865_p11 = pnand %p863_p10, %p860_p9 }
 0x53b   :  { %868 = shalt.err (!%p865_p11)
}
 0x53c   :  { %516 = dma.vmem_to_hbm [thread:$0]  %s514_s23, 16, %s1173_s10, [#allocation4]  }
 0x53d   :  { %875 = dma.done.wait [#allocation4], 16  }
 0x53e   :  { %876 = vsyncadd [#allocation4], 4294967280 }
 0x53f   :  { %520 = vsyncpa [#allocation3], 1 }
 0x540   :  { %521 = vsyncpa [#allocation6], 1 }
 0x541   :  { %522 = vsyncpa [#allocation9], 1 }
 0x542   :  { %523 = vsyncpa [#allocation4], 1 }

</bundles_post_ra>
